<compile_context>
chip_gen: v5e
topology: v5e:2x2
jax: 0.10.0
libtpu: 0.0.40
codegen_flags: <defaults>
</compile_context>

<pallas_src>
import functools

import jax
import jax.numpy as jnp
from jax.experimental import pallas as pl
from jax.experimental.pallas import tpu as pltpu


# ----------------------------------------------------------------------------
# Fused kernel: pre-gates + LSTM over T steps + row-select + MLP + softmax.
# ----------------------------------------------------------------------------
def make_fused_kernel(T, S, H, F3G, P, n_mlp, num_classes):
    def kernel(x_ref, wlstm_ref, bias_ref, mlp_ref, out_ref):
        # x_ref    : (T*S, F3G)        bf16  -- concatenated LSTM input
        # wlstm_ref: (F3G + H, 4H)     bf16  -- rows [0:F3G]=W_in, [F3G:]=W_hh
        # bias_ref : (1, 4H)           f32   -- b_ih + b_hh (i/f/o cols * 0.5)
        # mlp_ref  : (n_mlp*(P+1), P)  f32   -- zero-padded Linear weights/biases
        # out_ref  : (T, num_classes)  f32
        w_in = wlstm_ref[0:F3G, :]
        w_hh = wlstm_ref[F3G:F3G + H, :]
        bias = bias_ref[...]

        # Hoisted input projection: one MXU pass over all T*S rows, taken off
        # the serial h-recurrence path.
        pre_gates = jnp.dot(x_ref[...], w_in,
                            preferred_element_type=jnp.float32) + bias

        h = jnp.zeros((S, H), jnp.float32)
        c = jnp.zeros((S, H), jnp.float32)
        feat_rows = []
        # T is tiny (== graph batch); static unrolling keeps (h, c) in vregs.
        # TODO(synk): for large T, move T onto the grid with VMEM-carried
        # state and a pl.when-gated MLP epilogue instead of full unrolling.
        for t in range(T):
            gates = pre_gates[t * S:(t + 1) * S, :] + jnp.dot(
                h.astype(jnp.bfloat16), w_hh,
                preferred_element_type=jnp.float32)          # (S, 4H)
            # Single EUP pass for all four gates:
            # sigmoid(x) = 0.5*tanh(x/2) + 0.5, the 1/2 folded into the
            # i/f/o columns of W_in / W_hh / bias at init time.
            tg = jnp.tanh(gates)
            i_g = 0.5 * tg[:, 0 * H:1 * H] + 0.5
            f_g = 0.5 * tg[:, 1 * H:2 * H] + 0.5
            g_g = tg[:, 2 * H:3 * H]
            o_g = 0.5 * tg[:, 3 * H:4 * H] + 0.5
            c = f_g * c + i_g * g_g
            h = o_g * jnp.tanh(c)
            # Only LSTM-batch row S-1 is consumed downstream
            # (output1[:, -1, :] in the PyTorch forward).
            feat_rows.append(h[S - 1:S, :])

        x = jnp.concatenate(feat_rows, axis=0)                # (T, H), in vregs
        if H < P:
            x = jnp.concatenate(
                [x, jnp.zeros((T, P - H), jnp.float32)], axis=1)

        # MLP head: Linear+ReLU ... Linear, on zero-padded (P, P) blocks.
        mlp = mlp_ref[...]
        for li in range(n_mlp):
            base = li * (P + 1)
            w = mlp[base:base + P, :]
            b = mlp[base + P:base + P + 1, :]
            x = jnp.dot(x, w, preferred_element_type=jnp.float32) + b
            if li < n_mlp - 1:                                # no ReLU after last
                x = jnp.maximum(x, 0.0)

        logits = x[:, :num_classes]
        m = jnp.max(logits, axis=1, keepdims=True)
        e = jnp.exp(logits - m)
        out_ref[...] = e / jnp.sum(e, axis=1, keepdims=True)  # exact softmax

    return kernel


# ----------------------------------------------------------------------------
# Parameter construction (deterministic, mirrors PyTorch shapes/init ranges),
# packed into 3 arrays so the kernel needs only 4 input DMAs total.
# ----------------------------------------------------------------------------
def init_params(key, n_features_nodes, n_features_global, layer_1,
                layer_linear, num_classes):
    F = n_features_nodes
    G = n_features_global
    H = layer_1
    F3G = 3 * F + G
    dims = [H] + [int(d) for d in layer_linear.split('-')] + [num_classes]
    n_mlp = len(dims) - 1
    P = max(dims)

    ks = jax.random.split(key, 4 + 2 * n_mlp)

    def u(k, shape, fan_in):
        bound = 1.0 / jnp.sqrt(jnp.float32(fan_in))
        return jax.random.uniform(k, shape, jnp.float32, -bound, bound)

    # nn.LSTM params, stored transposed for x @ W, gate order i, f, g, o along
    # columns; b_ih + b_hh folded into one row.
    w_ih = u(ks[0], (F3G, 4 * H), H)
    w_hh = u(ks[1], (H, 4 * H), H)
    bias = u(ks[2], (1, 4 * H), H) + u(ks[3], (1, 4 * H), H)

    # Fold the 1/2 of sigmoid(x) = 0.5*tanh(x/2)+0.5 into i/f/o columns so the
    # kernel only needs one tanh per step for all four gates.
    col_scale = jnp.concatenate([
        jnp.full((1, 2 * H), 0.5, jnp.float32),   # i, f
        jnp.ones((1, H), jnp.float32),            # g (stays tanh)
        jnp.full((1, H), 0.5, jnp.float32),       # o
    ], axis=1)
    w_ih = w_ih * col_scale
    w_hh = w_hh * col_scale
    bias = bias * col_scale

    lstm_w = jnp.concatenate([w_ih, w_hh], axis=0).astype(jnp.bfloat16)

    # MLP head packed into a single zero-padded (n_mlp*(P+1), P) blob.
    # Layer li occupies rows [li*(P+1), li*(P+1)+P) = weight, then 1 bias row.
    blocks = []
    for li in range(n_mlp):
        wl = u(ks[4 + 2 * li], (dims[li], dims[li + 1]), dims[li])
        bl = u(ks[5 + 2 * li], (1, dims[li + 1]), dims[li])
        wl_pad = jnp.zeros((P, P), jnp.float32)
        wl_pad = wl_pad.at[:dims[li], :dims[li + 1]].set(wl)
        bl_pad = jnp.zeros((1, P), jnp.float32)
        bl_pad = bl_pad.at[:, :dims[li + 1]].set(bl)
        blocks.append(wl_pad)
        blocks.append(bl_pad)
    mlp_blob = jnp.concatenate(blocks, axis=0)

    return {"lstm_w": lstm_w, "bias": bias, "mlp": mlp_blob}


# ----------------------------------------------------------------------------
# Forward pass: free view/cat in JAX (same as the PyTorch forward), everything
# else in ONE Pallas kernel.
# ----------------------------------------------------------------------------
@functools.partial(jax.jit, static_argnames=("num_classes",))
def single_vector_network_forward(params, nodes, edge_indices, global_attr,
                                  num_nodes, num_edges, batch_indices,
                                  *, num_classes):
    # edge_indices / num_nodes / num_edges / batch_indices are unused, exactly
    # as in the PyTorch forward.
    del edge_indices, num_nodes, num_edges, batch_indices
    lstm_w = params["lstm_w"]
    bias = params["bias"]
    mlp_blob = params["mlp"]

    S = nodes.shape[1]
    F = nodes.shape[2]
    G = global_attr.shape[1]
    H = bias.shape[1] // 4
    F3G = 3 * F + G
    P = mlp_blob.shape[1]
    n_mlp = mlp_blob.shape[0] // (P + 1)

    # Same view/cat structure as the PyTorch forward (tiny, effectively free).
    nodes_r = nodes.reshape(-1, 3, S, F)              # (B, 3, S, F)
    B = nodes_r.shape[0]
    gattr_r = global_attr.reshape(B, S, G)            # (B, S, G)
    input_n = jnp.concatenate(
        [nodes_r[:, 0], nodes_r[:, 1], nodes_r[:, 2], gattr_r], axis=2)
    x_all = input_n.reshape(B * S, F3G).astype(jnp.bfloat16)

    kernel = make_fused_kernel(B, S, H, F3G, P, n_mlp, num_classes)

    # TODO(synk): for batched inference over many independent graph batches on
    # v7x, add a leading "parallel" grid axis over instances to use both TCs.
    return pl.pallas_call(
        kernel,
        out_shape=jax.ShapeDtypeStruct((B, num_classes), jnp.float32),
        grid_spec=pltpu.PrefetchScalarGridSpec(
            num_scalar_prefetch=0,
            grid=(),
            in_specs=[
                pl.BlockSpec(x_all.shape, lambda: (0, 0)),
                pl.BlockSpec(lstm_w.shape, lambda: (0, 0)),
                pl.BlockSpec(bias.shape, lambda: (0, 0)),
                pl.BlockSpec(mlp_blob.shape, lambda: (0, 0)),
            ],
            out_specs=pl.BlockSpec((B, num_classes), lambda: (0, 0)),
        ),
    )(x_all, lstm_w, bias, mlp_blob)


if __name__ == "__main__":
    # Module config (small): IN = 3*4 + 4 = 16, layer_1 = 32, head "16-8" -> 4
    n_features_nodes = 4
    n_features_global = 4
    layer_1 = 32
    layer_linear = "16-8"
    num_classes = 4

    B = 2   # graph batch (becomes the LSTM time axis)
    S = 8   # per-graph sequence length (becomes the LSTM batch axis)

    key = jax.random.PRNGKey(0)
    kp, kn, kg = jax.random.split(key, 3)

    params = init_params(kp, n_features_nodes, n_features_global, layer_1,
                         layer_linear, num_classes)

    nodes = jax.random.normal(kn, (3 * B, S, n_features_nodes), jnp.float32)
    global_attr = jax.random.normal(kg, (B * S, n_features_global), jnp.float32)
    edge_indices = jnp.zeros((2, 4), jnp.int32)      # unused in forward
    num_nodes = jnp.array([S] * B, jnp.int32)        # unused in forward
    num_edges = jnp.array([4] * B, jnp.int32)        # unused in forward
    batch_indices = jnp.zeros((3 * B,), jnp.int32)   # unused in forward

    out = single_vector_network_forward(
        params, nodes, edge_indices, global_attr,
        num_nodes, num_edges, batch_indices, num_classes=num_classes)
    out = jax.block_until_ready(out)

    assert out.shape == (B, num_classes)
    assert bool(jnp.all(jnp.isfinite(out)))
    # exact softmax -> rows sum to 1 within f32 rounding
    assert bool(jnp.allclose(jnp.sum(out, axis=1), 1.0, atol=1e-4))
    print("KERNEL_OK")
</pallas_src>

<mosaic_0001>
module attributes {stable_mosaic.version = 11 : i64} {
  func.func @kernel(%arg0: memref<16x16xbf16, #tpu.memory_space<vmem>>, %arg1: memref<48x128xbf16, #tpu.memory_space<vmem>>, %arg2: memref<1x128xf32, #tpu.memory_space<vmem>>, %arg3: memref<99x32xf32, #tpu.memory_space<vmem>>, %arg4: memref<2x4xf32, #tpu.memory_space<vmem>>) attributes {dimension_semantics = [], scalar_prefetch = 0 : i64, scratch_operands = 0 : i64, tpu.core_type = #tpu.core_type<tc>} {
    %c0 = arith.constant 0 : index
    %c0_0 = arith.constant 0 : index
    %0 = vector.load %arg1[%c0, %c0_0] : memref<48x128xbf16, #tpu.memory_space<vmem>>, vector<16x128xbf16>
    %c16 = arith.constant 16 : index
    %c0_1 = arith.constant 0 : index
    %1 = vector.load %arg1[%c16, %c0_1] : memref<48x128xbf16, #tpu.memory_space<vmem>>, vector<32x128xbf16>
    %c0_2 = arith.constant 0 : index
    %c0_3 = arith.constant 0 : index
    %2 = vector.load %arg2[%c0_2, %c0_3] : memref<1x128xf32, #tpu.memory_space<vmem>>, vector<1x128xf32>
    %c0_4 = arith.constant 0 : index
    %c0_5 = arith.constant 0 : index
    %3 = vector.load %arg0[%c0_4, %c0_5] : memref<16x16xbf16, #tpu.memory_space<vmem>>, vector<16x16xbf16>
    %cst = arith.constant dense<0.000000e+00> : vector<16x128xf32>
    %4 = tpu.matmul %3, %0, %cst {dimension_numbers = #tpu.dot_dimension_numbers<[1], [0], [0], [1], [0, 0, 1, 1], [], []>} : vector<16x16xbf16>, vector<16x128xbf16>, vector<16x128xf32> -> vector<16x128xf32>
    %5 = vector.broadcast %2 : vector<1x128xf32> to vector<16x128xf32>
    %6 = arith.addf %4, %5 : vector<16x128xf32>
    %cst_6 = arith.constant 0.000000e+00 : f32
    %7 = vector.broadcast %cst_6 : f32 to vector<8x32xf32>
    %cst_7 = arith.constant 0.000000e+00 : f32
    %8 = vector.broadcast %cst_7 : f32 to vector<8x32xf32>
    %9 = vector.extract_strided_slice %6 {offsets = [0, 0], sizes = [8, 128], strides = [1, 1]} : vector<16x128xf32> to vector<8x128xf32>
    %10 = arith.truncf %7 : vector<8x32xf32> to vector<8x32xbf16>
    %cst_8 = arith.constant dense<0.000000e+00> : vector<8x128xf32>
    %11 = tpu.matmul %10, %1, %cst_8 {dimension_numbers = #tpu.dot_dimension_numbers<[1], [0], [0], [1], [0, 0, 1, 1], [], []>} : vector<8x32xbf16>, vector<32x128xbf16>, vector<8x128xf32> -> vector<8x128xf32>
    %12 = arith.addf %9, %11 : vector<8x128xf32>
    %13 = math.tanh %12 : vector<8x128xf32>
    %14 = vector.extract_strided_slice %13 {offsets = [0, 0], sizes = [8, 32], strides = [1, 1]} : vector<8x128xf32> to vector<8x32xf32>
    %cst_9 = arith.constant 5.000000e-01 : f32
    %15 = vector.broadcast %cst_9 : f32 to vector<8x32xf32>
    %16 = arith.mulf %15, %14 : vector<8x32xf32>
    %cst_10 = arith.constant 5.000000e-01 : f32
    %17 = vector.broadcast %cst_10 : f32 to vector<8x32xf32>
    %18 = arith.addf %16, %17 : vector<8x32xf32>
    %19 = vector.extract_strided_slice %13 {offsets = [0, 32], sizes = [8, 32], strides = [1, 1]} : vector<8x128xf32> to vector<8x32xf32>
    %cst_11 = arith.constant 5.000000e-01 : f32
    %20 = vector.broadcast %cst_11 : f32 to vector<8x32xf32>
    %21 = arith.mulf %20, %19 : vector<8x32xf32>
    %cst_12 = arith.constant 5.000000e-01 : f32
    %22 = vector.broadcast %cst_12 : f32 to vector<8x32xf32>
    %23 = arith.addf %21, %22 : vector<8x32xf32>
    %24 = vector.extract_strided_slice %13 {offsets = [0, 64], sizes = [8, 32], strides = [1, 1]} : vector<8x128xf32> to vector<8x32xf32>
    %25 = vector.extract_strided_slice %13 {offsets = [0, 96], sizes = [8, 32], strides = [1, 1]} : vector<8x128xf32> to vector<8x32xf32>
    %cst_13 = arith.constant 5.000000e-01 : f32
    %26 = vector.broadcast %cst_13 : f32 to vector<8x32xf32>
    %27 = arith.mulf %26, %25 : vector<8x32xf32>
    %cst_14 = arith.constant 5.000000e-01 : f32
    %28 = vector.broadcast %cst_14 : f32 to vector<8x32xf32>
    %29 = arith.addf %27, %28 : vector<8x32xf32>
    %30 = arith.mulf %23, %8 : vector<8x32xf32>
    %31 = arith.mulf %18, %24 : vector<8x32xf32>
    %32 = arith.addf %30, %31 : vector<8x32xf32>
    %33 = math.tanh %32 : vector<8x32xf32>
    %34 = arith.mulf %29, %33 : vector<8x32xf32>
    %35 = vector.extract_strided_slice %34 {offsets = [7, 0], sizes = [1, 32], strides = [1, 1]} : vector<8x32xf32> to vector<1x32xf32>
    %36 = vector.extract_strided_slice %6 {offsets = [8, 0], sizes = [8, 128], strides = [1, 1]} : vector<16x128xf32> to vector<8x128xf32>
    %37 = arith.truncf %34 : vector<8x32xf32> to vector<8x32xbf16>
    %cst_15 = arith.constant dense<0.000000e+00> : vector<8x128xf32>
    %38 = tpu.matmul %37, %1, %cst_15 {dimension_numbers = #tpu.dot_dimension_numbers<[1], [0], [0], [1], [0, 0, 1, 1], [], []>} : vector<8x32xbf16>, vector<32x128xbf16>, vector<8x128xf32> -> vector<8x128xf32>
    %39 = arith.addf %36, %38 : vector<8x128xf32>
    %40 = math.tanh %39 : vector<8x128xf32>
    %41 = vector.extract_strided_slice %40 {offsets = [0, 0], sizes = [8, 32], strides = [1, 1]} : vector<8x128xf32> to vector<8x32xf32>
    %cst_16 = arith.constant 5.000000e-01 : f32
    %42 = vector.broadcast %cst_16 : f32 to vector<8x32xf32>
    %43 = arith.mulf %42, %41 : vector<8x32xf32>
    %cst_17 = arith.constant 5.000000e-01 : f32
    %44 = vector.broadcast %cst_17 : f32 to vector<8x32xf32>
    %45 = arith.addf %43, %44 : vector<8x32xf32>
    %46 = vector.extract_strided_slice %40 {offsets = [0, 32], sizes = [8, 32], strides = [1, 1]} : vector<8x128xf32> to vector<8x32xf32>
    %cst_18 = arith.constant 5.000000e-01 : f32
    %47 = vector.broadcast %cst_18 : f32 to vector<8x32xf32>
    %48 = arith.mulf %47, %46 : vector<8x32xf32>
    %cst_19 = arith.constant 5.000000e-01 : f32
    %49 = vector.broadcast %cst_19 : f32 to vector<8x32xf32>
    %50 = arith.addf %48, %49 : vector<8x32xf32>
    %51 = vector.extract_strided_slice %40 {offsets = [0, 64], sizes = [8, 32], strides = [1, 1]} : vector<8x128xf32> to vector<8x32xf32>
    %52 = vector.extract_strided_slice %40 {offsets = [0, 96], sizes = [8, 32], strides = [1, 1]} : vector<8x128xf32> to vector<8x32xf32>
    %cst_20 = arith.constant 5.000000e-01 : f32
    %53 = vector.broadcast %cst_20 : f32 to vector<8x32xf32>
    %54 = arith.mulf %53, %52 : vector<8x32xf32>
    %cst_21 = arith.constant 5.000000e-01 : f32
    %55 = vector.broadcast %cst_21 : f32 to vector<8x32xf32>
    %56 = arith.addf %54, %55 : vector<8x32xf32>
    %57 = arith.mulf %50, %32 : vector<8x32xf32>
    %58 = arith.mulf %45, %51 : vector<8x32xf32>
    %59 = arith.addf %57, %58 : vector<8x32xf32>
    %60 = math.tanh %59 : vector<8x32xf32>
    %61 = arith.mulf %56, %60 : vector<8x32xf32>
    %62 = vector.extract_strided_slice %61 {offsets = [7, 0], sizes = [1, 32], strides = [1, 1]} : vector<8x32xf32> to vector<1x32xf32>
    %63 = tpu.concatenate %35, %62 in 0 : vector<1x32xf32>, vector<1x32xf32> -> vector<2x32xf32>
    %c0_22 = arith.constant 0 : index
    %c0_23 = arith.constant 0 : index
    %64 = vector.load %arg3[%c0_22, %c0_23] : memref<99x32xf32, #tpu.memory_space<vmem>>, vector<99x32xf32>
    %65 = vector.extract_strided_slice %64 {offsets = [0, 0], sizes = [32, 32], strides = [1, 1]} : vector<99x32xf32> to vector<32x32xf32>
    %66 = vector.extract_strided_slice %64 {offsets = [32, 0], sizes = [1, 32], strides = [1, 1]} : vector<99x32xf32> to vector<1x32xf32>
    %cst_24 = arith.constant dense<0.000000e+00> : vector<2x32xf32>
    %67 = tpu.matmul %63, %65, %cst_24 {dimension_numbers = #tpu.dot_dimension_numbers<[1], [0], [0], [1], [0, 0, 1, 1], [], []>} : vector<2x32xf32>, vector<32x32xf32>, vector<2x32xf32> -> vector<2x32xf32>
    %68 = vector.broadcast %66 : vector<1x32xf32> to vector<2x32xf32>
    %69 = arith.addf %67, %68 : vector<2x32xf32>
    %cst_25 = arith.constant 0.000000e+00 : f32
    %70 = vector.broadcast %cst_25 : f32 to vector<2x32xf32>
    %71 = arith.maximumf %69, %70 : vector<2x32xf32>
    %72 = vector.extract_strided_slice %64 {offsets = [33, 0], sizes = [32, 32], strides = [1, 1]} : vector<99x32xf32> to vector<32x32xf32>
    %73 = vector.extract_strided_slice %64 {offsets = [65, 0], sizes = [1, 32], strides = [1, 1]} : vector<99x32xf32> to vector<1x32xf32>
    %cst_26 = arith.constant dense<0.000000e+00> : vector<2x32xf32>
    %74 = tpu.matmul %71, %72, %cst_26 {dimension_numbers = #tpu.dot_dimension_numbers<[1], [0], [0], [1], [0, 0, 1, 1], [], []>} : vector<2x32xf32>, vector<32x32xf32>, vector<2x32xf32> -> vector<2x32xf32>
    %75 = vector.broadcast %73 : vector<1x32xf32> to vector<2x32xf32>
    %76 = arith.addf %74, %75 : vector<2x32xf32>
    %cst_27 = arith.constant 0.000000e+00 : f32
    %77 = vector.broadcast %cst_27 : f32 to vector<2x32xf32>
    %78 = arith.maximumf %76, %77 : vector<2x32xf32>
    %79 = vector.extract_strided_slice %64 {offsets = [66, 0], sizes = [32, 32], strides = [1, 1]} : vector<99x32xf32> to vector<32x32xf32>
    %80 = vector.extract_strided_slice %64 {offsets = [98, 0], sizes = [1, 32], strides = [1, 1]} : vector<99x32xf32> to vector<1x32xf32>
    %cst_28 = arith.constant dense<0.000000e+00> : vector<2x32xf32>
    %81 = tpu.matmul %78, %79, %cst_28 {dimension_numbers = #tpu.dot_dimension_numbers<[1], [0], [0], [1], [0, 0, 1, 1], [], []>} : vector<2x32xf32>, vector<32x32xf32>, vector<2x32xf32> -> vector<2x32xf32>
    %82 = vector.broadcast %80 : vector<1x32xf32> to vector<2x32xf32>
    %83 = arith.addf %81, %82 : vector<2x32xf32>
    %84 = vector.extract_strided_slice %83 {offsets = [0, 0], sizes = [2, 4], strides = [1, 1]} : vector<2x32xf32> to vector<2x4xf32>
    %cst_29 = arith.constant dense<0xFF800000> : vector<2xf32>
    %85 = vector.multi_reduction <maximumf>, %84, %cst_29 [1] : vector<2x4xf32> to vector<2xf32>
    %86 = vector.shape_cast %85 : vector<2xf32> to vector<2x1xf32>
    %87 = vector.broadcast %86 : vector<2x1xf32> to vector<2x4xf32>
    %88 = arith.subf %84, %87 : vector<2x4xf32>
    %89 = math.exp %88 : vector<2x4xf32>
    %cst_30 = arith.constant dense<0.000000e+00> : vector<2xf32>
    %90 = vector.multi_reduction <add>, %89, %cst_30 [1] : vector<2x4xf32> to vector<2xf32>
    %91 = vector.shape_cast %90 : vector<2xf32> to vector<2x1xf32>
    %92 = vector.broadcast %91 : vector<2x1xf32> to vector<2x4xf32>
    %93 = arith.divf %89, %92 : vector<2x4xf32>
    %c0_31 = arith.constant 0 : index
    %c0_32 = arith.constant 0 : index
    %94 = vector.load %arg4[%c0_31, %c0_32] : memref<2x4xf32, #tpu.memory_space<vmem>>, vector<2x4xf32>
    tpu.vector_store %arg4[%c0_31, %c0_32], %93 {strides = array<i32>} : memref<2x4xf32, #tpu.memory_space<vmem>>, vector<2x4xf32>,
    return
  }
}

</mosaic_0001>

<bundles_post_ra>
// kernel: single_vector_network_forward.1
= control target key start
LH: loop header
LB: loop body
LE: loop exit
PB: predicated region body
PF: predicated region fallthrough
CT: control target
= control target key end

     0   :  { %vm42_vm0 = vcmask 130048   ;;  %s504_s0 = inlined_call_operand.vmem [shape: bf16[16,16], index: 0, kind: input, shape index: {}]   ;;  %s505_s1 = inlined_call_operand.vmem [shape: bf16[48,128], index: 1, kind: input, shape index: {}]   ;;  %s506_s2 = inlined_call_operand.vmem [shape: f32[1,128], index: 2, kind: input, shape index: {}]   ;;  %s507_s3 = inlined_call_operand.vmem [shape: f32[99,32], index: 3, kind: input, shape index: {}]   ;;  %s508_s4 = inlined_call_operand.hbm [shape: f32[2,4], index: 4, kind: output, shape index: {}]  }
   0x1   :  { %v348_v0 = vld [vmem:[%s505_s1] sm:$0xff]  ;;  %v350_v1 = vld [vmem:[%s505_s1 + $0x10] sm:$0xff]  ;;  %v349_v3 = vld [vmem:[%s505_s1 + $0x8] sm:$0xff] }
   0x2   :  { %v351_v2 = vld [vmem:[%s504_s0] sm:$0xff]  ;;  %53 = vmatpush.bf16.msra.mxu0 %v348_v0  ;;  %82 = vmatpush.bf16.msra.mxu1 %v350_v1 }
   0x3   :  { %9 = vsyncpa [#allocation3], 0  ;;  %123 = vmatpush.bf16.msra.mxu2 %v350_v1  ;;  %v395_v4 = vmov 0   ;;  %v356_v5 = vld [vmem:[%s506_s2] ss:$0 sm:$0xff]  ;;  %s396_s0 = smov 64  }
   0x4   :  { %s397_s1 = smov 32   ;;  %vm72_vm1 = vcmask 261120   ;;  %v162_v38 = vld [vmem:[%s507_s3 + $0x18] sm:$0xff]  ;;  %v161_v39 = vld [vmem:[%s507_s3 + $0x10] sm:$0xff]  ;;  %v160_v40 = vld [vmem:[%s507_s3 + $0x8] sm:$0xff]  ;;  %vm157_vm2 = vcmask 1040384  }
   0x5   :  { %335 = vmatmul.msk.bf16.vlgmr.msra.gmra.mxu0 %vm42_vm0, %v351_v2  ;;  %190 = vmatpush.msra.mxu3 %v162_v38  ;;  %v159_v41 = vld [vmem:[%s507_s3] sm:$0xff]  ;;  %v166_v47 = vld [vmem:[%s507_s3 + $0x38] sm:$0xff]  ;;  %vm205_vm3 = vcmask 1046528   ;;  %v165_v49 = vld [vmem:[%s507_s3 + $0x30] sm:$0xff]  ;;  %vm248_vm4 = vcmask 1045504   ;;  %vm285_vm5 = vcmask 25600  }
   0x6   :  { %83 = vmatpush.bf16.msra.mxu1 %v349_v3  ;;  %v167_v48 = vld [vmem:[%s507_s3 + $0x40] sm:$0xff]  ;;  %v211_v50 = vrot.slane %v166_v47, 1  ;;  %v209_v52 = vrot.slane %v165_v49, 1  ;;  %v164_v56 = vld [vmem:[%s507_s3 + $0x28] sm:$0xff]  ;;  %v170_v62 = vld [vmem:[%s507_s3 + $0x58] sm:$0xff]  ;;  %s318_s2 = sshll.u32 %s508_s4, 4  ;;  %s319_s2 = int_to_ptr.hbm [resolvable:$true] %s318_s2 }
   0x7   :  { %124 = vmatpush.bf16.msra.mxu2 %v349_v3  ;;  %191 = vmatpush.msra.mxu3 %v161_v39  ;;  %v213_v51 = vrot.slane %v167_v48, 1  ;;  %v207_v57 = vrot.slane %v164_v56, 1  ;;  %v163_v58 = vld [vmem:[%s507_s3 + $0x20] sm:$0xff]  ;;  %v169_v0 = vld [vmem:[%s507_s3 + $0x50] sm:$0xff]  ;;  %v254_v1 = vrot.slane %v170_v62, 2 }
   0x8   :  { %v212_v54 = vsel %vm205_vm3, %v209_v52, %v211_v50  ;;  %v206_v59 = vrot.slane %v163_v58, 1  ;;  %v171_v63 = vld [vmem:[%s507_s3 + $0x60] sm:$0x7]  ;;  %v252_v3 = vrot.slane %v169_v0, 2 }
   0x9   :  { %84 = vmatmul.bf16.vlgmr.msra.gmra.mxu1 %v395_v4  ;;  %192 = vmatpush.msra.mxu3 %v160_v40  ;;  %v214_v53 = vsel %vm205_vm3, %v211_v50, %v213_v51  ;;  %v210_v60 = vsel %vm205_vm3, %v207_v57, %v209_v52  ;;  %v256_v2 = vrot.slane %v171_v63, 2  ;;  %v168_v4 = vld [vmem:[%s507_s3 + $0x48] sm:$0xff]  ;;  %s398_s3 = smov [#allocation2]  }
   0xa   :  { %v208_v61 = vsel %vm205_vm3, %v206_v59, %v207_v57  ;;  %s316_s24 = sshll.u32 %s398_s3, 4  ;;  %s317_s24 = int_to_ptr.vmem [resolvable:$true] %s316_s24 }
   0xb   :  { %193 = vmatpush.msra.mxu3 %v159_v41 }
   0xd   :  { %234 = vmatpush.msrb.mxu3 %v214_v53 }
   0xf   :  { %235 = vmatpush.msrb.mxu3 %v212_v54 }
  0x11   :  { %236 = vmatpush.msrb.mxu3 %v210_v60 }
  0x13   :  { %237 = vmatpush.msrb.mxu3 %v208_v61 }
  0x82   :  { %v55_v6 = vpop.f32.mrf.mxu0 }
  0x83   :  { %v56_v7 = vadd.f32 %v356_v5, %v55_v6  ;;  %v257_v6 = vsel %vm248_vm4, %v254_v1, %v256_v2 }
  0x84   :  { %277 = vmatpush.msrb.mxu0 %v257_v6 }
  0x86   :  { %v85_v8 = vpop.f32.mrf.mxu1 }
  0x87   :  { %v89_v9 = vadd.f32 %v85_v8, %v56_v7  ;;  %v255_v7 = vsel %vm248_vm4, %v252_v3, %v254_v1 }
  0x88   :  { %278 = vmatpush.msrb.mxu0 %v255_v7 }
  0x89   :  { %357 = vtanh.f32 %v89_v9  ;;  %v172_v9 = vperm.slane %v163_v58, 0 }
  0x8a   :  { %v57_v24 = vpop.f32.mrf.mxu0 }
  0x8b   :  { %v58_v25 = vadd.f32 %v356_v5, %v57_v24  ;;  %v250_v5 = vrot.slane %v168_v4, 2 }
  0x8d   :  { %v253_v8 = vsel %vm248_vm4, %v250_v5, %v252_v3 }
  0x8e   :  { %v87_v10 = vpop.f32.mrf.mxu1  ;;  %279 = vmatpush.msrb.mxu0 %v253_v8 }
  0x8f   :  { %v358_v11 = vpop.eup %357 }
  0x90   :  { %95 = vrot.lane.b32.xlu0 %v358_v11, %s396_s0  ;;  %v91_v12 = vmul.f32 0.5, %v358_v11 }
  0x92   :  { %v92_v13 = vadd.f32 0.5, %v91_v12 }
  0x94   :  { %v93_v16 = vmul.f32 0.0, %v92_v13 }
 0x102   :  { %v96_v14 = vpop.permute.xlu0 %95 }
 0x103   :  { %v98_v15 = vmul.f32 %v96_v14, %v92_v13 }
 0x105   :  { %100 = vrot.lane.b32.xlu0 %v98_v15, %s397_s1  ;;  %v199_v15 = vperm.slane %v167_v48, 1 }
 0x177   :  { %v101_v17 = vpop.permute.xlu0 %100 }
 0x178   :  { %v103_v18 = vadd.f32 %v101_v17, %v93_v16 }
 0x17a   :  { %359 = vtanh.f32 %v103_v18 }
 0x180   :  { %v360_v19 = vpop.eup %359 }
 0x181   :  { %106 = vrot.lane.b32.xlu1 %v360_v19, %s396_s0  ;;  %v243_v19 = vperm.slane %v171_v63, 2 }
 0x1f3   :  { %v107_v20 = vpop.permute.xlu1 %106 }
 0x1f4   :  { %v109_v21 = vmul.f32 %v107_v20, %v92_v13  ;;  %v249_v13 = vrot.slane %v167_v48, 2 }
 0x1f6   :  { %v110_v22 = vpack.c.bf16 %v109_v21, %v109_v21  ;;  %v152_v44 = vrot.slane %v109_v21, 7  ;;  %v251_v14 = vsel %vm248_vm4, %v249_v13, %v250_v5 }
 0x1f7   :  { %280 = vmatpush.msrb.mxu0 %v251_v14 }
 0x1f8   :  { %112 = vrot.lane.b32.xlu1 %v110_v22, %s397_s1 }
 0x26a   :  { %v113_v23 = vpop.permute.xlu1 %112 }
 0x26b   :  { %344 = vmatmul.msk.bf16.vlgmr.msra.gmra.mxu2 %vm72_vm1, %v113_v23 }
 0x2ee   :  { %v126_v26 = vpop.f32.mrf.mxu2 }
 0x2ef   :  { %v130_v27 = vadd.f32 %v126_v26, %v58_v25 }
 0x2f1   :  { %361 = vtanh.f32 %v130_v27 }
 0x2f6   :  { %v128_v28 = vpop.f32.mrf.mxu2 }
 0x2f7   :  { %v362_v29 = vpop.eup %361 }
 0x2f8   :  { %136 = vrot.lane.b32.xlu2 %v362_v29, %s396_s0  ;;  %v132_v30 = vmul.f32 0.5, %v362_v29 }
 0x2fa   :  { %v133_v31 = vadd.f32 0.5, %v132_v30 }
 0x2fc   :  { %v134_v34 = vmul.f32 %v133_v31, %v103_v18 }
 0x352   :  { %v137_v32 = vpop.permute.xlu2 %136 }
 0x353   :  { %v139_v33 = vmul.f32 %v137_v32, %v133_v31 }
 0x355   :  { %141 = vrot.lane.b32.xlu2 %v139_v33, %s397_s1 }
 0x3af   :  { %v142_v35 = vpop.permute.xlu2 %141 }
 0x3b0   :  { %v144_v36 = vadd.f32 %v142_v35, %v134_v34 }
 0x3b2   :  { %363 = vtanh.f32 %v144_v36 }
 0x3b8   :  { %v364_v37 = vpop.eup %363 }
 0x3b9   :  { %147 = vrot.lane.b32.xlu0 %v364_v37, %s396_s0 }
 0x42b   :  { %v148_v42 = vpop.permute.xlu0 %147 }
 0x42c   :  { %v150_v43 = vmul.f32 %v148_v42, %v133_v31 }
 0x42e   :  { %v155_v45 = vrot.slane %v150_v43, 6 }
 0x430   :  { %v158_v46 = vsel %vm157_vm2, %v152_v44, %v155_v45 }
 0x431   :  { %174 = vrot.lane.b32.xlu1 %v158_v46, %s397_s1 }
 0x4a3   :  { %v175_v55 = vpop.permute.xlu1 %174 }
 0x4a4   :  { %345 = vmatmul.msk.f32.vlgmr.msra.gmra.mxu3 %vm72_vm1, %v175_v55 }
 0x527   :  { %v195_v10 = vpop.f32.mrf.mxu3 }
 0x528   :  { %v196_v11 = vadd.f32 %v195_v10, %v172_v9 }
 0x52a   :  { %v198_v12 = vmax.f32 %v196_v11, 0.0 }
 0x52c   :  { %346 = vmatmul.msk.f32.vlgmr.msrb.gmra.mxu3 %vm72_vm1, %v198_v12 }
 0x5af   :  { %v239_v16 = vpop.f32.mrf.mxu3 }
 0x5b0   :  { %v240_v17 = vadd.f32 %v239_v16, %v199_v15 }
 0x5b2   :  { %v242_v18 = vmax.f32 %v240_v17, 0.0 }
 0x5b4   :  { %347 = vmatmul.msk.f32.vlgmr.msrb.gmra.mxu0 %vm72_vm1, %v242_v18 }
 0x631   :  { %v282_v20 = vpop.f32.mrf.mxu0 }
 0x632   :  { %v283_v21 = vadd.f32 %v282_v20, %v243_v19 }
 0x634   :  { %v286_v22 = vsel %vm285_vm5, %v283_v21, -inf }
 0x635   :  { %287 = vmax.xlane.f32.xlu2 %v286_v22 }
 0x6a8   :  { %v288_v23 = vpop.xlane.xlu2 %287 }
 0x6a9   :  { %v289_v24 = vsub.f32 %v283_v21, %v288_v23 }
 0x6ab   :  { %v290_v25 = vmul.f32 1.442695, %v289_v24 }
 0x6ad   :  { %365 = vpow2.f32 %v290_v25 }
 0x6b3   :  { %v366_v26 = vpop.eup %365 }
 0x6b4   :  { %v292_v27 = vsel %vm285_vm5, %v366_v26, 0.0 }
 0x6b5   :  { %293 = vadd.xlane.f32.xlu0 %v292_v27 }
 0x728   :  { %v294_v28 = vpop.xlane.xlu0 %293 }
 0x729   :  { %367 = vrcp.f32 %v294_v28  ;;  %v306_v32 = vand.u32 2147483648, %v294_v28  ;;  %v304_v34 = vand.u32 2147483647, %v294_v28  ;;  %vm300_vm7 = vweird.f32 %v294_v28 }
 0x72b   :  { %v307_v36 = vor.u32 1.1754944e-38, %v306_v32  ;;  %vm305_vm9 = vcmp.eq.f32.partialorder %v304_v34, 8.507059e+37 }
 0x72f   :  { %v368_v29 = vpop.eup %367 }
 0x730   :  { %v296_v30 = vmul.f32 %v368_v29, %v294_v28  ;;  %vm301_vm6 = vweird.f32 %v368_v29 }
 0x731   :  { %vm302_vm8 = vmor %vm300_vm7, %vm301_vm6 }
 0x732   :  { %v297_v31 = vsub.f32 1.0, %v296_v30 }
 0x734   :  { %v298_v33 = vmul.f32 %v368_v29, %v297_v31 }
 0x736   :  { %v299_v35 = vadd.f32 %v368_v29, %v298_v33 }
 0x738   :  { %v303_v37 = vsel %vm302_vm8, %v368_v29, %v299_v35 }
 0x739   :  { %v308_v38 = vsel %vm305_vm9, %v307_v36, %v303_v37 }
 0x73a   :  { %v309_v39 = vmul.f32 %v366_v26, %v308_v38 }
 0x73c   :  { %310 = vst.msk [vmem:[#allocation2] sm:$0x3] %vm285_vm5, %v309_v39 }
 0x73d   :  { %321 = dma.vmem_to_hbm [thread:$0]  %s317_s24, 32, %s319_s2, [#allocation3]  }
 0x73e   :  { %393 = dma.done.wait [#allocation3], 32  }
 0x73f   :  { %394 = vsyncadd [#allocation3], 4294967264 }
 0x740   :  { %326 = vsyncpa [#allocation3], 1 }

</bundles_post_ra>
